<compile_context>
chip_gen: v7x
topology: tpu7x:2x2x1
jax: 0.10.0
libtpu: 0.0.40
codegen_flags: <defaults>
</compile_context>

<pallas_src>
import numpy as np
import jax
import jax.numpy as jnp
from jax.experimental import pallas as pl
from jax.experimental.pallas import tpu as pltpu


def _round_up(x, m):
    return ((x + m - 1) // m) * m


def _vmem_capacity_bytes():
    """Physical per-core VMEM, generation aware, with safe fallbacks."""
    try:
        cap = getattr(pltpu.get_tpu_info(), "vmem_capacity_bytes", None)
        if cap:
            return int(cap)
    except Exception:
        pass
    try:
        if "7" in jax.devices()[0].device_kind.lower():
            return 64 << 20            # v7x: 64 MiB / TensorCore
    except Exception:
        pass
    return 128 << 20                   # v5e / v6e


def _bf16_vpu_native():
    """v6e/v7x have bf16-native VPU/EUP; v5 and earlier do not."""
    try:
        kind = jax.devices()[0].device_kind.lower()
    except Exception:
        return False
    return not any(t in kind for t in ("v2", "v3", "v4", "v5"))


def _make_kernel(hp, compute_dtype, ew_dtype):
    def kernel(x_ref, waug_ref, w2_ref, out_ref):
        # x_ref:    [TB, F]          features | one-hot mask (single fused LHS)
        # waug_ref: [F, 2*Hp+Ep]     [W1cat + b1-fold | gate-expand | b2] slab
        # w2_ref:   [Hp, Ep]         K-stacked encoder weights
        # out_ref:  [TB, Ep]         lane-dense encoder output (E padded)
        z = jnp.dot(x_ref[...], waug_ref[...], preferred_element_type=ew_dtype)
        h = z[:, :hp]                    # xf @ W1cat + (selected branch's) b1
        gate = z[:, hp:2 * hp]           # exact {0,1} hidden-slot gate
        bias = z[:, 2 * hp:]             # selected branch's encoder bias (b2)
        hg = (jnp.maximum(h, 0.0) * gate).astype(compute_dtype)
        acc = jnp.dot(hg, w2_ref[...], preferred_element_type=jnp.float32)
        out_ref[...] = (acc + bias.astype(jnp.float32)).astype(out_ref.dtype)
    return kernel


def pack_aggregate_or_exclusive_params(w1, b1, w2, b2,
                                       compute_dtype=jnp.float32):
    """Pack per-sublayer (zero-padded) Linear params into two fused slabs.

    w1: [S, max_in, H], b1: [S, H], w2: [S, H, E], b2: [S, E]
    Returns (waug [max_in+S, 2*Hp+Ep], w2stk [Hp, Ep]) with
      Hp = round_up(S*H, 128), Ep = round_up(E, 128).
    """
    w1 = np.asarray(w1, np.float32); b1 = np.asarray(b1, np.float32)
    w2 = np.asarray(w2, np.float32); b2 = np.asarray(b2, np.float32)
    S, max_in, H = w1.shape
    E = w2.shape[2]
    Hp = _round_up(S * H, 128)
    Ep = _round_up(E, 128)
    F = max_in + S

    waug = np.zeros((F, 2 * Hp + Ep), np.float32)
    w2stk = np.zeros((Hp, Ep), np.float32)
    for i in range(S):
        lo, hi = i * H, (i + 1) * H
        waug[:max_in, lo:hi] = w1[i]                 # feature rows -> W1cat
        waug[max_in + i, lo:hi] = b1[i]              # b1 folded into h-block
        waug[max_in + i, Hp + lo:Hp + hi] = 1.0      # one-hot -> slot gate
        waug[max_in + i, 2 * Hp:2 * Hp + E] = b2[i]  # b2 into bias block
        w2stk[lo:hi, :E] = w2[i]
    cd = jnp.dtype(compute_dtype)
    return jnp.asarray(waug, cd), jnp.asarray(w2stk, cd)


def aggregate_or_exclusive(x, packed_params, max_sublayer_input_size,
                           output_encoding_size, *, block_b=None,
                           compute_dtype=jnp.float32):
    """x: [B, max_in + S].  Returns [B, E + S] (encoder output | mask)."""
    waug, w2stk = packed_params
    B, F = x.shape
    max_in = max_sublayer_input_size
    Hp, Ep = w2stk.shape
    Wcols = waug.shape[1]
    E = output_encoding_size
    assert waug.shape[0] == F and Wcols == 2 * Hp + Ep and E <= Ep

    compute_dtype = jnp.dtype(compute_dtype)
    is_bf16 = compute_dtype == jnp.bfloat16
    # Elementwise ReLU/gating dtype: bf16 only where the VPU is bf16-native.
    ew_dtype = compute_dtype if (is_bf16 and _bf16_vpu_native()) else jnp.float32
    # bf16 path: stream x and the kernel output in bf16 (halves HBM traffic).
    out_dtype = compute_dtype if is_bf16 else x.dtype

    if waug.dtype != compute_dtype:
        waug = waug.astype(compute_dtype)
    if w2stk.dtype != compute_dtype:
        w2stk = w2stk.astype(compute_dtype)
    x_in = x if x.dtype == compute_dtype else x.astype(compute_dtype)

    # --- generation-aware batch tile + VMEM budget --------------------------
    vmem_cap = _vmem_capacity_bytes()
    if block_b is None:
        block_b = 256 if vmem_cap <= (64 << 20) else 512
    cd_it = compute_dtype.itemsize
    ew_it = jnp.dtype(ew_dtype).itemsize
    out_it = jnp.dtype(out_dtype).itemsize
    # Conservative: count weights double-buffered even though we request
    # single buffering below.
    weight_bytes = 2 * (waug.size + w2stk.size) * cd_it

    def need_bytes(tb):
        io = 2 * tb * F * cd_it + 2 * tb * Ep * out_it            # x/out tiles
        inter = tb * Wcols * ew_it + tb * Hp * cd_it + tb * Ep * 4  # z, hg, acc
        return weight_bytes + io + inter + (4 << 20)

    vmem_budget = min(int(vmem_cap * 0.8), vmem_cap - (8 << 20))
    TB = _round_up(max(8, min(block_b, _round_up(B, 8))), 8)
    while TB > 8 and need_bytes(TB) > vmem_budget:
        TB = max(8, _round_up(TB // 2, 8))
    vmem_limit = int(min(max(need_bytes(TB), 32 << 20), vmem_budget))

    # No batch-pad concat: last tile is clipped by Pallas; rows independent.
    grid = (pl.cdiv(B, TB),)
    cost = pl.CostEstimate(
        flops=2 * B * (F * Wcols + Hp * Ep),
        transcendentals=0,
        bytes_accessed=int(B * F * cd_it + B * Ep * out_it
                           + (waug.size + w2stk.size) * cd_it))
    kernel = _make_kernel(Hp, compute_dtype, ew_dtype)

    def call(single_buffer_weights):
        wkw = ({"pipeline_mode": pl.Buffered(1)}
               if single_buffer_weights else {})
        return pl.pallas_call(
            kernel,
            out_shape=jax.ShapeDtypeStruct((B, Ep), out_dtype),
            grid=grid,
            in_specs=[
                pl.BlockSpec((TB, F), lambda i: (i, 0)),             # batch tile
                pl.BlockSpec((F, Wcols), lambda i: (0, 0), **wkw),   # resident
                pl.BlockSpec((Hp, Ep), lambda i: (0, 0), **wkw),     # resident
            ],
            out_specs=pl.BlockSpec((TB, Ep), lambda i: (i, 0)),      # lane dense
            compiler_params=pltpu.CompilerParams(
                dimension_semantics=("parallel",),
                vmem_limit_bytes=vmem_limit),
            cost_estimate=cost,
        )(x_in, waug, w2stk)

    try:
        acc = call(True)       # single-buffer the VMEM-resident weight slabs
    except Exception:
        acc = call(False)      # pl.Buffered(1) unsupported -> default buffers

    # Pure passthrough glue in XLA: trim lane padding, append sublayer mask.
    # NOTE: multi-hot mask rows would SUM branches here (PyTorch overwrites);
    # the module contract is exact one-hot, under which both agree.
    return jnp.concatenate([acc[:, :E].astype(x.dtype), x[:, max_in:]], axis=-1)


def _build_params(key, sublayer_input_sizes, sublayer_hidden_sizes,
                  output_encoding_size):
    """Deterministic per-sublayer Linear weights, zero-padded to common shapes."""
    S = len(sublayer_input_sizes)
    max_in = int(np.max(sublayer_input_sizes))
    max_hid = int(np.max(sublayer_hidden_sizes))
    E = output_encoding_size

    w1 = np.zeros((S, max_in, max_hid), np.float32)
    b1 = np.zeros((S, max_hid), np.float32)
    w2 = np.zeros((S, max_hid, E), np.float32)
    b2 = np.zeros((S, E), np.float32)

    keys = jax.random.split(key, 4 * S)
    for i in range(S):
        in_i, hid_i = sublayer_input_sizes[i], sublayer_hidden_sizes[i]
        w1[i, :in_i, :hid_i] = np.asarray(
            jax.random.normal(keys[4 * i + 0], (in_i, hid_i)) * 0.1)
        b1[i, :hid_i] = np.asarray(
            jax.random.normal(keys[4 * i + 1], (hid_i,)) * 0.1)
        w2[i, :hid_i, :] = np.asarray(
            jax.random.normal(keys[4 * i + 2], (hid_i, E)) * 0.1)
        b2[i, :] = np.asarray(
            jax.random.normal(keys[4 * i + 3], (E,)) * 0.1)
    return w1, b1, w2, b2


def _reference_numpy(x, w1, b1, w2, b2, sublayer_input_sizes, max_in, E):
    """Plain-numpy emulation of the PyTorch forward (exclusive gather/scatter)."""
    x = np.asarray(x, np.float32)
    w1 = np.asarray(w1); b1 = np.asarray(b1)
    w2 = np.asarray(w2); b2 = np.asarray(b2)
    S = len(sublayer_input_sizes)
    mask = x[:, max_in:]
    out = np.zeros((x.shape[0], E + S), np.float32)
    for i in range(S):
        rows = np.where(mask[:, i] == 1)[0]
        if len(rows) == 0:
            continue
        in_i = sublayer_input_sizes[i]
        h = np.maximum(x[rows, :in_i] @ w1[i, :in_i, :] + b1[i], 0.0)
        out[rows, :E] = h @ w2[i] + b2[i]
    out[:, E:] = mask
    return out


if __name__ == "__main__":
    # Small synthetic configuration (module contract: mask is exact one-hot).
    sublayer_input_sizes = [16, 24, 32]
    sublayer_hidden_sizes = [24, 32, 16]
    output_encoding_size = 32
    S = len(sublayer_input_sizes)
    max_in = int(np.max(sublayer_input_sizes))
    E = output_encoding_size
    B = 50   # not a multiple of the batch tile -> exercises the clipped tile

    key = jax.random.PRNGKey(0)
    k_param, k_feat, k_mask = jax.random.split(key, 3)

    w1, b1, w2, b2 = _build_params(k_param, sublayer_input_sizes,
                                   sublayer_hidden_sizes, output_encoding_size)

    feats = jax.random.normal(k_feat, (B, max_in), jnp.float32)
    sel = jax.random.randint(k_mask, (B,), 0, S)
    mask = jax.nn.one_hot(sel, S, dtype=jnp.float32)
    x = jnp.concatenate([feats, mask], axis=-1)   # [B, max_in + S]

    ref = _reference_numpy(x, w1, b1, w2, b2, sublayer_input_sizes, max_in, E)

    # f32 compute path: matches the reference tightly.
    packed_f32 = pack_aggregate_or_exclusive_params(w1, b1, w2, b2, jnp.float32)
    out_f32 = aggregate_or_exclusive(x, packed_f32, max_in, E,
                                     block_b=32, compute_dtype=jnp.float32)
    out_f32 = jax.block_until_ready(out_f32)
    np.testing.assert_allclose(np.asarray(out_f32), ref, rtol=1e-5, atol=1e-5)

    # bf16 matmul + bf16 I/O path (f32 accumulation): loose sanity check.
    packed_bf16 = pack_aggregate_or_exclusive_params(w1, b1, w2, b2,
                                                     jnp.bfloat16)
    out_bf16 = aggregate_or_exclusive(x, packed_bf16, max_in, E,
                                      block_b=32, compute_dtype=jnp.bfloat16)
    out_bf16 = jax.block_until_ready(out_bf16)
    np.testing.assert_allclose(np.asarray(out_bf16), ref, rtol=1e-1, atol=1e-1)

    print("KERNEL_OK")
</pallas_src>

<mosaic_0001>
module attributes {stable_mosaic.version = 11 : i64} {
  func.func @kernel(%arg0: i32, %arg1: memref<32x35xf32, #tpu.memory_space<vmem>>, %arg2: memref<35x384xf32, #tpu.memory_space<vmem>>, %arg3: memref<128x128xf32, #tpu.memory_space<vmem>>, %arg4: memref<32x128xf32, #tpu.memory_space<vmem>>) attributes {dimension_semantics = [#tpu.dimension_semantics<parallel>], iteration_bounds = array<i64: 2>, scalar_prefetch = 0 : i64, scratch_operands = 0 : i64, tpu.core_type = #tpu.core_type<tc>, window_params = [{transform_indices = @transform_0, window_bounds = array<i64: 32, 35>}, {pipeline_mode = #tpu.pipeline_mode<synchronous>, transform_indices = @transform_1, window_bounds = array<i64: 35, 384>}, {pipeline_mode = #tpu.pipeline_mode<synchronous>, transform_indices = @transform_2, window_bounds = array<i64: 128, 128>}, {transform_indices = @transform_3, window_bounds = array<i64: 32, 128>}]} {
    %c0 = arith.constant 0 : index
    %c0_0 = arith.constant 0 : index
    %0 = vector.load %arg1[%c0, %c0_0] : memref<32x35xf32, #tpu.memory_space<vmem>>, vector<32x35xf32>
    %c0_1 = arith.constant 0 : index
    %c0_2 = arith.constant 0 : index
    %1 = vector.load %arg2[%c0_1, %c0_2] : memref<35x384xf32, #tpu.memory_space<vmem>>, vector<35x384xf32>
    %cst = arith.constant dense<0.000000e+00> : vector<32x384xf32>
    %2 = tpu.matmul %0, %1, %cst {dimension_numbers = #tpu.dot_dimension_numbers<[1], [0], [0], [1], [0, 0, 1, 1], [], []>} : vector<32x35xf32>, vector<35x384xf32>, vector<32x384xf32> -> vector<32x384xf32>
    %3 = vector.extract_strided_slice %2 {offsets = [0, 0], sizes = [32, 128], strides = [1, 1]} : vector<32x384xf32> to vector<32x128xf32>
    %4 = vector.extract_strided_slice %2 {offsets = [0, 128], sizes = [32, 128], strides = [1, 1]} : vector<32x384xf32> to vector<32x128xf32>
    %5 = vector.extract_strided_slice %2 {offsets = [0, 256], sizes = [32, 128], strides = [1, 1]} : vector<32x384xf32> to vector<32x128xf32>
    %cst_3 = arith.constant 0.000000e+00 : f32
    %6 = vector.broadcast %cst_3 : f32 to vector<32x128xf32>
    %7 = arith.maximumf %3, %6 : vector<32x128xf32>
    %8 = arith.mulf %7, %4 : vector<32x128xf32>
    %c0_4 = arith.constant 0 : index
    %c0_5 = arith.constant 0 : index
    %9 = vector.load %arg3[%c0_4, %c0_5] : memref<128x128xf32, #tpu.memory_space<vmem>>, vector<128x128xf32>
    %cst_6 = arith.constant dense<0.000000e+00> : vector<32x128xf32>
    %10 = tpu.matmul %8, %9, %cst_6 {dimension_numbers = #tpu.dot_dimension_numbers<[1], [0], [0], [1], [0, 0, 1, 1], [], []>} : vector<32x128xf32>, vector<128x128xf32>, vector<32x128xf32> -> vector<32x128xf32>
    %11 = arith.addf %10, %5 : vector<32x128xf32>
    %c0_7 = arith.constant 0 : index
    %c0_8 = arith.constant 0 : index
    %12 = vector.load %arg4[%c0_7, %c0_8] : memref<32x128xf32, #tpu.memory_space<vmem>>, vector<32x128xf32>
    tpu.vector_store %arg4[%c0_7, %c0_8], %11 {strides = array<i32>} : memref<32x128xf32, #tpu.memory_space<vmem>>, vector<32x128xf32>,
    return
  }
  func.func @transform_0(%arg0: i32) -> (i32, i32) {
    %c0_i32 = arith.constant 0 : i32
    %c0_i32_0 = arith.constant 0 : i32
    return %arg0, %c0_i32 : i32, i32
  }
  func.func @transform_1(%arg0: i32) -> (i32, i32) {
    %c0_i32 = arith.constant 0 : i32
    %c0_i32_0 = arith.constant 0 : i32
    %c0_i32_1 = arith.constant 0 : i32
    return %c0_i32, %c0_i32_0 : i32, i32
  }
  func.func @transform_2(%arg0: i32) -> (i32, i32) {
    %c0_i32 = arith.constant 0 : i32
    %c0_i32_0 = arith.constant 0 : i32
    %c0_i32_1 = arith.constant 0 : i32
    return %c0_i32, %c0_i32_0 : i32, i32
  }
  func.func @transform_3(%arg0: i32) -> (i32, i32) {
    %c0_i32 = arith.constant 0 : i32
    %c0_i32_0 = arith.constant 0 : i32
    return %arg0, %c0_i32 : i32, i32
  }
}

module attributes {stable_mosaic.version = 11 : i64} {
  func.func @kernel(%arg0: i32, %arg1: memref<32x35xf32, #tpu.memory_space<vmem>>, %arg2: memref<35x384xf32, #tpu.memory_space<vmem>>, %arg3: memref<128x128xf32, #tpu.memory_space<vmem>>, %arg4: memref<32x128xf32, #tpu.memory_space<vmem>>) attributes {dimension_semantics = [#tpu.dimension_semantics<parallel>], iteration_bounds = array<i64: 2>, scalar_prefetch = 0 : i64, scratch_operands = 0 : i64, tpu.core_type = #tpu.core_type<tc>, window_params = [{transform_indices = @transform_0, window_bounds = array<i64: 32, 35>}, {pipeline_mode = #tpu.pipeline_mode<synchronous>, transform_indices = @transform_1, window_bounds = array<i64: 35, 384>}, {pipeline_mode = #tpu.pipeline_mode<synchronous>, transform_indices = @transform_2, window_bounds = array<i64: 128, 128>}, {transform_indices = @transform_3, window_bounds = array<i64: 32, 128>}]} {
    %c0 = arith.constant 0 : index
    %c0_0 = arith.constant 0 : index
    %0 = vector.load %arg1[%c0, %c0_0] : memref<32x35xf32, #tpu.memory_space<vmem>>, vector<32x35xf32>
    %c0_1 = arith.constant 0 : index
    %c0_2 = arith.constant 0 : index
    %1 = vector.load %arg2[%c0_1, %c0_2] : memref<35x384xf32, #tpu.memory_space<vmem>>, vector<35x384xf32>
    %cst = arith.constant dense<0.000000e+00> : vector<32x384xf32>
    %2 = tpu.matmul %0, %1, %cst {dimension_numbers = #tpu.dot_dimension_numbers<[1], [0], [0], [1], [0, 0, 1, 1], [], []>} : vector<32x35xf32>, vector<35x384xf32>, vector<32x384xf32> -> vector<32x384xf32>
    %3 = vector.extract_strided_slice %2 {offsets = [0, 0], sizes = [32, 128], strides = [1, 1]} : vector<32x384xf32> to vector<32x128xf32>
    %4 = vector.extract_strided_slice %2 {offsets = [0, 128], sizes = [32, 128], strides = [1, 1]} : vector<32x384xf32> to vector<32x128xf32>
    %5 = vector.extract_strided_slice %2 {offsets = [0, 256], sizes = [32, 128], strides = [1, 1]} : vector<32x384xf32> to vector<32x128xf32>
    %cst_3 = arith.constant 0.000000e+00 : f32
    %6 = vector.broadcast %cst_3 : f32 to vector<32x128xf32>
    %7 = arith.maximumf %3, %6 : vector<32x128xf32>
    %8 = arith.mulf %7, %4 : vector<32x128xf32>
    %c0_4 = arith.constant 0 : index
    %c0_5 = arith.constant 0 : index
    %9 = vector.load %arg3[%c0_4, %c0_5] : memref<128x128xf32, #tpu.memory_space<vmem>>, vector<128x128xf32>
    %cst_6 = arith.constant dense<0.000000e+00> : vector<32x128xf32>
    %10 = tpu.matmul %8, %9, %cst_6 {dimension_numbers = #tpu.dot_dimension_numbers<[1], [0], [0], [1], [0, 0, 1, 1], [], []>} : vector<32x128xf32>, vector<128x128xf32>, vector<32x128xf32> -> vector<32x128xf32>
    %11 = arith.addf %10, %5 : vector<32x128xf32>
    %c0_7 = arith.constant 0 : index
    %c0_8 = arith.constant 0 : index
    %12 = vector.load %arg4[%c0_7, %c0_8] : memref<32x128xf32, #tpu.memory_space<vmem>>, vector<32x128xf32>
    tpu.vector_store %arg4[%c0_7, %c0_8], %11 {strides = array<i32>} : memref<32x128xf32, #tpu.memory_space<vmem>>, vector<32x128xf32>,
    return
  }
  func.func @transform_0(%arg0: i32) -> (i32, i32) {
    %c0_i32 = arith.constant 0 : i32
    %c0_i32_0 = arith.constant 0 : i32
    return %arg0, %c0_i32 : i32, i32
  }
  func.func @transform_1(%arg0: i32) -> (i32, i32) {
    %c0_i32 = arith.constant 0 : i32
    %c0_i32_0 = arith.constant 0 : i32
    %c0_i32_1 = arith.constant 0 : i32
    return %c0_i32, %c0_i32_0 : i32, i32
  }
  func.func @transform_2(%arg0: i32) -> (i32, i32) {
    %c0_i32 = arith.constant 0 : i32
    %c0_i32_0 = arith.constant 0 : i32
    %c0_i32_1 = arith.constant 0 : i32
    return %c0_i32, %c0_i32_0 : i32, i32
  }
  func.func @transform_3(%arg0: i32) -> (i32, i32) {
    %c0_i32 = arith.constant 0 : i32
    %c0_i32_0 = arith.constant 0 : i32
    return %arg0, %c0_i32 : i32, i32
  }
}

</mosaic_0001>

<bundles_post_ra>
// kernel: tpu_custom_call.1
= control target key start
LH: loop header
LB: loop body
LE: loop exit
PB: predicated region body
PF: predicated region fallthrough
CT: control target
= control target key end

     0   :  { %8 = vsyncpa [#allocation3], 0  ;;  %s1261_s0 = inlined_call_operand.vmem [shape: f32[50,35], index: 0, kind: input, shape index: {}]   ;;  %s1262_s1 = inlined_call_operand.hbm [shape: f32[35,384], index: 1, kind: input, shape index: {}]   ;;  %s1263_s2 = inlined_call_operand.hbm [shape: f32[128,128], index: 2, kind: input, shape index: {}]   ;;  %s1264_s3 = inlined_call_operand.hbm [shape: f32[50,128], index: 3, kind: output, shape index: {}]  }
   0x1   :  { %9 = vsyncpa [#allocation6], 0 }
   0x2   :  { %10 = vsyncpa [#allocation4], 0 }
   0x3   :  { %12 = vsyncpa [#allocation4 + $0x1], 0  ;;  %s1050_s12 = smov 0   ;;  %s1052_s13 = smov 0  }
   0x4   :  { %s1054_s14 = smov 0   ;;  %s1056_s15 = smov 0  }
   0x5 LB: > { %s1071_s16 = sadd.s32 4294967295, %s1018_s15   ;;  %s659_s17 = sadd.s32 4294967294, %s1018_s15   ;;  %s1018_s15 = sphi %s1056_s15, %s1281_s15   ;;  %s1014_s14 = sphi %s1054_s14, %s1280_s14   ;;  %s1010_s13 = sphi %s1052_s13, %s1279_s13   ;;  %s1006_s12 = sphi %s1050_s12, %s1278_s12  }
   0x6   : > { %s1075_s18 = sadd.s32 1, %s1018_s15   ;;  %s93_s19 = sadd.s32 1, %s1014_s14 }
   0x7   : > { %s90_s20 = ssub.s32 %s1018_s15, %s1075_s18  ;;  %p103_p0 = scmp.ne.s32.totalorder %s1014_s14, %s1010_s13 }
   0x8   : > { %p91_p1 = scmp.eq.s32.totalorder %s90_s20, 0  ;;  %p104_p2 = scmp.eq.s32.totalorder %s1071_s16, 1 }
   0x9   : > { %p109_p3 = scmp.ne.s32.totalorder %s1010_s13, %s1006_s12  ;;  %p110_p4 = scmp.eq.s32.totalorder %s659_s17, 1 }
   0xa   : > { %s1086_s21 = scalar_select %p91_p1, %s1014_s14, %s93_s19  }
   0xb   : > { %p1088_p5 = por %p104_p2, %p103_p0  ;;  %p1092_p6 = por %p110_p4, %p109_p3 }
   0xc   : > { %p660_p7 = scmp.ge.s32.totalorder %s1018_s15, 1  ;;  %p117_p8 = scmp.lt.s32.totalorder %s1018_s15, 3 }
   0xd   : > { %s1267_s22 = scalar_select %p1088_p5, 1, 0 }
   0xe   : > { %s1268_s23 = scalar_select %p1092_p6, 1, 0 }
   0xf   : > { %p1265_p9 = scmp.eq.s32.totalorder %s1071_s16, 0  ;;  %p1099_p10 = pnand %p660_p7, %p117_p8 }
  0x10   : > { %s1020_s25 = smov [#allocation2]   ;;  %s1021_s28 = smov [#allocation5]  }
  0x11   : > { %s1269_s24 = scalar_select %p1099_p10, 1, 0 }
  0x12   : > { %s129_s26 = sshll.u32 %s1020_s25, 4  ;;  %p835_p11 = pneg %p1099_p10  ;;  %s130_s26 = int_to_ptr.vmem [resolvable:$true] %s129_s26 }
  0x13   : > { %s142_s29 = sshll.u32 %s1021_s28, 4  ;;  %s892_s5 = scalar_lea.hbm %s1262_s1, 1920  ;;  %s1111_s29 = int_to_ptr.vmem [resolvable:$true] %s142_s29 }
  0x14   : > { %p1107_p12 = pnand %p1265_p9, %p835_p11  ;;  %p893_p13 = scmp.ne.s32.totalorder %s1262_s1, %s892_s5 }
  0x15   : > { %p899_p3 = scmp.lt.u32.totalorder %s892_s5, %s1262_s1 }
  0x16   : > { %p894_p0 = pneg %p1107_p12 }
  0x18   : > { %p895_p1 = pnand %p894_p0, %p893_p13 }
  0x1a   : > { %p896_p2 = pneg %p895_p1 }
  0x1c   : > { %p901_p4 = pnand %p899_p3, %p896_p2 }
  0x1e   : > { %904 = shalt.err (!%p901_p4)
}
  0x1f   : > { %s905_s10 = scalar_lea.vmem %s130_s26, 1920  ;;  %p913_p9 = scmp.lt.s32.totalorder %s130_s26, %s130_s26 }
  0x20   : > { %p906_p7 = scmp.ne.s32.totalorder %s130_s26, %s905_s10  ;;  %p914_p6 = scmp.lt.s32.totalorder %s905_s10, %s905_s10 }
  0x22   : > { %p908_p8 = pnand %p906_p7, %p894_p0  ;;  %p915_p5 = por %p914_p6, %p913_p9 }
  0x24   : > { %p909_p11 = pneg %p908_p8 }
  0x26   : > { %p916_p10 = pnand %p915_p5, %p909_p11 }
  0x28   : > { %919 = shalt.err (!%p916_p10)
}
  0x29   : > { %s1022_s11 = smov 384   ;;  %s1023_s17 = smov 24  }
  0x2a   : > { %838 = dma.hbm_to_vmem [thread:$0]  (!%p1107_p12), %s1262_s1, 1920, %s130_s26, [#allocation3], %s1022_s11, %s1022_s11, %s1023_s17  }
  0x2b   : > { %s920_s30 = scalar_lea.hbm %s1263_s2, 2048 }
  0x2c   : > { %p921_p13 = scmp.ne.s32.totalorder %s1263_s2, %s920_s30  ;;  %p927_p9 = scmp.lt.u32.totalorder %s920_s30, %s1263_s2 }
  0x2e   : > { %p923_p5 = pnand %p921_p13, %p894_p0 }
  0x30   : > { %p924_p6 = pneg %p923_p5 }
  0x32   : > { %p929_p10 = pnand %p927_p9, %p924_p6 }
  0x34   : > { %932 = shalt.err (!%p929_p10)
}
  0x35   : > { %s933_s26 = scalar_lea.vmem %s1111_s29, 2048  ;;  %p941_p4 = scmp.lt.s32.totalorder %s1111_s29, %s1111_s29 }
  0x36   : > { %p934_p1 = scmp.ne.s32.totalorder %s1111_s29, %s933_s26  ;;  %p942_p7 = scmp.lt.s32.totalorder %s933_s26, %s933_s26 }
  0x38   : > { %p936_p2 = pnand %p934_p1, %p894_p0  ;;  %p943_p8 = por %p942_p7, %p941_p4 }
  0x3a   : > { %p937_p3 = pneg %p936_p2 }
  0x3c   : > { %p944_p11 = pnand %p943_p8, %p937_p3 }
  0x3e   : > { %947 = shalt.err (!%p944_p11)
}
  0x3f   : > { %s1024_s8 = smov 128   ;;  %s1025_s9 = smov 8  }
  0x40   : > { %841 = dma.hbm_to_vmem [thread:$0]  (!%p1107_p12), %s1263_s2, 2048, %s1111_s29, [#allocation6], %s1024_s8, %s1024_s8, %s1025_s9  }
  0x41   : > { %p1271_p13 = scmp.ne.s32.totalorder %s1269_s24, 0 }
  0x42   : > { %p1272_p0 = scmp.eq.s32.totalorder (!%p1271_p13), %s1071_s16, 0 }
  0x43   : > { %175 = sbr.rel (%p1271_p13) target bundleno = 563 (0x233), region = 32 }
  0x4a   : > { %993 = dma.done.wait (%p1272_p0), [#allocation3], 1920   ;;  %p1273_p5 = pmov %p1272_p0 }
  0x4b   : > { %p1274_p6 = pmov %p1272_p0 }
  0x4c   : > { %995 = vsyncadd (%p1273_p5), [#allocation3], 4294965376 }
  0x4d   : > { %997 = dma.done.wait (%p1274_p6), [#allocation6], 2048   ;;  %p1275_p9 = pmov %p1272_p0 }
  0x4e   : > { %s1171_s27 = sshll.u32 %s1071_s16, 2  ;;  %v1026_v0 = vmov 0.0   ;;  %v231_v1 = vld [vmem:[#allocation2 + $0x8] sm:$0xff]  ;;  %v234_v2 = vld [vmem:[#allocation2 + $0x20] sm:$0xff]  ;;  %v233_v5 = vld [vmem:[#allocation2 + $0x18] sm:$0xff]  ;;  %vm258_vm0 = vcmask 1042432  }
  0x4f   : > { %999 = vsyncadd (%p1275_p9), [#allocation6], 4294965248  ;;  %332 = vmatprep.mubr.f32.mxu0 %v1026_v0  ;;  %p212_p12 = scmp.lt.s32.totalorder %s1171_s27, 6  ;;  %v230_v3 = vld [vmem:[#allocation2] sm:$0xff]  ;;  %v774_v4 = vpack.c.bf16 %v234_v2, %v231_v1  ;;  %v237_v6 = vld [vmem:[#allocation2 + $0x38] sm:$0xff]  ;;  %vm245_vm1 = vcmask 285696  }
  0x50   : > { %v240_v7 = vld [vmem:[#allocation2 + $0x50] sm:$0xff]  ;;  %v776_v8 = vpack.c.bf16 %v233_v5, %v230_v3  ;;  %v239_v11 = vld [vmem:[#allocation2 + $0x48] sm:$0xff]  ;;  %v450_v13 = vld [vmem:[#allocation5] sm:$0xff]  ;;  %s204_s25 = sand.u32 1, %s1010_s13   ;;  %p1276_p10 = scmp.ne.s32.totalorder %s1267_s22, 0 }
  0x51   : > { %s213_s24 = scalar_select %p212_p12, %s1171_s27, 6  ;;  %v778_v9 = vpack.c.bf16 %v240_v7, %v237_v6  ;;  %v236_v10 = vld [vmem:[#allocation2 + $0x30] sm:$0xff]  ;;  %775 = vmatprep.subr.bf16.mxu0 %v774_v4  ;;  %v451_v14 = vld [vmem:[#allocation5 + $0x8] sm:$0xff]  ;;  %v452_v15 = vld [vmem:[#allocation5 + $0x10] sm:$0xff] }
  0x52   : > { %777 = vmatpush1.bf16.msra.mxu0 %v776_v8  ;;  %v780_v12 = vpack.c.bf16 %v239_v11, %v236_v10  ;;  %v453_v16 = vld [vmem:[#allocation5 + $0x18] sm:$0xff]  ;;  %v243_v17 = vld [vmem:[#allocation2 + $0x68] sm:$0x7]  ;;  %v790_v18 = vpack.c.bf16 %v451_v14, %v450_v13  ;;  %v454_v20 = vld [vmem:[#allocation5 + $0x20] sm:$0xff]  ;;  %s667_s28 = sshll.u32 %s204_s25, 5  ;;  %s1201_s4 = scalar_lea.sflag [#allocation4], %s204_s25 }
  0x53   : > { %s669_s29 = sshll.u32 %s213_s24, 3  ;;  %779 = vmatprep.subr.bf16.mxu0 %v778_v9  ;;  %v794_v19 = vpack.c.bf16 %v453_v16, %v452_v15  ;;  %v455_v21 = vld [vmem:[#allocation5 + $0x28] sm:$0xff]  ;;  %v232_v22 = vld [vmem:[#allocation2 + $0x10] sm:$0xff]  ;;  %v235_v23 = vld [vmem:[#allocation2 + $0x28] sm:$0xff]  ;;  %s206_s30 = scalar_lea.vmem [#allocation7], %s667_s28 }
  0x54   : > { %s1179_s20 = scalar_lea.vmem %s1261_s0, %s669_s29  ;;  %791 = vmatprep.subr.bf16.mxu1 %v790_v18  ;;  %v242_v24 = vld [vmem:[#allocation2 + $0x60] sm:$0x7]  ;;  %v798_v26 = vpack.c.bf16 %v455_v21, %v454_v20  ;;  %v456_v27 = vld [vmem:[#allocation5 + $0x30] sm:$0xff]  ;;  %v457_v28 = vld [vmem:[#allocation5 + $0x38] sm:$0xff]  ;;  %v782_v29 = vpack.c.bf16 %v235_v23, %v232_v22  ;;  %s564_s5 = ssub.s32 (%p1276_p10), 7, %s1171_s27 }
  0x55   : > { %793 = vmatpush3.bf16.msra.mxu1 %v790_v18  ;;  %v226_v25 = vld [vmem:[%s1179_s20] sm:$0xff]  ;;  %v227_v30 = vld [vmem:[%s1179_s20 + $0x8] sm:$0xff]  ;;  %v802_v31 = vpack.c.bf16 %v457_v28, %v456_v27  ;;  %v458_v32 = vld [vmem:[#allocation5 + $0x40] sm:$0xff]  ;;  %p565_p1 = scmp.lt.s32.totalorder (%p1276_p10), %s564_s5, 4 }
  0x56   : > { %781 = vmatpush1.bf16.msra.mxu0 %v780_v12  ;;  %795 = vmatprep.subr.bf16.mxu1 %v794_v19  ;;  %v459_v33 = vld [vmem:[#allocation5 + $0x48] sm:$0xff]  ;;  %v228_v34 = vld [vmem:[%s1179_s20 + $0x10] sm:$0xff]  ;;  %v460_v36 = vld [vmem:[#allocation5 + $0x50] sm:$0xff] }
  0x57   : > { %670 = vmatprep.subr.msk.mxu0 %vm258_vm0, %v243_v17  ;;  %v806_v35 = vpack.c.bf16 %v459_v33, %v458_v32  ;;  %v461_v37 = vld [vmem:[#allocation5 + $0x58] sm:$0xff]  ;;  %v229_v38 = vld [vmem:[%s1179_s20 + $0x18] sm:$0xff]  ;;  %v462_v40 = vld [vmem:[#allocation5 + $0x60] sm:$0xff] }
  0x58   : > { %v810_v39 = vpack.c.bf16 %v461_v37, %v460_v36  ;;  %v463_v41 = vld [vmem:[#allocation5 + $0x68] sm:$0xff]  ;;  %v241_v44 = vld [vmem:[#allocation2 + $0x58] sm:$0xff]  ;;  %v464_v46 = vld [vmem:[#allocation5 + $0x70] sm:$0xff] }
  0x59   : > { %797 = vmatpush3.bf16.msra.mxu1 %v794_v19  ;;  %v814_v42 = vpack.c.bf16 %v463_v41, %v462_v40  ;;  %v238_v43 = vld [vmem:[#allocation2 + $0x40] sm:$0xff]  ;;  %v465_v47 = vld [vmem:[#allocation5 + $0x78] sm:$0xff] }
  0x5a   : > { %671 = vmatpush1.msk.msra.mxu0 %vm258_vm0, %v242_v24  ;;  %799 = vmatprep.subr.bf16.mxu1 %v798_v26  ;;  %v786_v45 = vpack.c.bf16 %v241_v44, %v238_v43  ;;  %v818_v48 = vpack.c.bf16 %v465_v47, %v464_v46  ;;  %v244_v49 = vld [vmem:[#allocation2 + $0x70] sm:$0x7] }
  0x5b   : > { %672 = vmatmul.mubr.msk.f32.vlgmr.msra.gmra.mrb[0].mxu0 %vm245_vm1, %v226_v25  ;;  %783 = vmatprep.subr.bf16.mxu0 %v782_v29 }
  0x5c   : > { %338 = vmatprep.mubr.f32.mxu0 %v1026_v0  ;;  %785 = vmatpush3.bf16.msra.mxu0 %v782_v29 }
  0x5d   : > { %801 = vmatpush3.bf16.msra.mxu1 %v798_v26  ;;  %787 = vmatprep.subr.bf16.mxu0 %v786_v45 }
  0x5e   : > { %803 = vmatprep.subr.bf16.mxu1 %v802_v31 }
  0x5f   : > { %673 = vmatmul.mubr.msk.f32.gmra.mrb[2].mxu0 %vm245_vm1, %v227_v30 }
  0x60   : > { %344 = vmatprep.mubr.f32.mxu0 %v1026_v0  ;;  %789 = vmatpush3.bf16.msra.mxu0 %v786_v45 }
  0x61   : > { %805 = vmatpush3.bf16.msra.mxu1 %v802_v31  ;;  %728 = vmatprep.subr.msk.mxu0 %vm258_vm0, %v244_v49 }
  0x62   : > { %807 = vmatprep.subr.bf16.mxu1 %v806_v35 }
  0x63   : > { %674 = vmatmul.mubr.msk.f32.gmra.mrb[4].mxu0 %vm245_vm1, %v228_v34 }
  0x64   : > { %350 = vmatprep.mubr.f32.mxu0 %v1026_v0  ;;  %729 = vmatpush3.msk.msra.mxu0 %vm258_vm0, %v244_v49 }
  0x65   : > { %809 = vmatpush3.bf16.msra.mxu1 %v806_v35 }
  0x66   : > { %811 = vmatprep.subr.bf16.mxu1 %v810_v39 }
  0x67   : > { %675 = vmatmul.mubr.msk.f32.gmra.mrb[6].mxu0 %vm245_vm1, %v229_v38 }
  0x68   : > { %730 = vmatprep.mubr.msk.f32.mxu0 %vm245_vm1, %v226_v25 }
  0x69   : > { %813 = vmatpush3.bf16.msra.mxu1 %v810_v39 }
  0x6a   : > { %815 = vmatprep.subr.bf16.mxu1 %v814_v42 }
  0x6b   : > { %731 = vmatmul.mubr.msk.f32.vlgmr.msra.gmra.mrb[8].mxu0 %vm245_vm1, %v227_v30 }
  0x6c   : > { %733 = vmatprep.mubr.msk.f32.mxu0 %vm245_vm1, %v228_v34 }
  0x6d   : > { %817 = vmatpush3.bf16.msra.mxu1 %v814_v42 }
  0x6e   : > { %819 = vmatprep.subr.bf16.mxu1 %v818_v48 }
  0x6f   : > { %734 = vmatmul.mubr.msk.f32.gmra.mrb[10].mxu0 %vm245_vm1, %v229_v38 }
  0x71   : > { %821 = vmatpush3.bf16.msra.mxu1 %v818_v48 }
 0x12e   : > { %v334_v50 = vpop.f32.mrb[0].mxu0 }
 0x12f   : > { %v442_v51 = vmax.f32 %v334_v50, 0.0  ;;  %v336_v52 = vpop.f32.mrb[1].mxu0 }
 0x131   : > { %v446_v53 = vmul.f32 %v442_v51, %v336_v52 }
 0x132   : > { %v340_v54 = vpop.f32.mrb[2].mxu0 }
 0x133   : > { %v443_v55 = vmax.f32 %v340_v54, 0.0  ;;  %v342_v56 = vpop.f32.mrb[3].mxu0  ;;  %768 = vmatprep.mubr.f32.mxu1 %v446_v53 }
 0x135   : > { %v447_v57 = vmul.f32 %v443_v55, %v342_v56 }
 0x136   : > { %v346_v58 = vpop.f32.mrb[4].mxu0 }
 0x137   : > { %v444_v59 = vmax.f32 %v346_v58, 0.0  ;;  %v348_v60 = vpop.f32.mrb[5].mxu0  ;;  %769 = vmatmul.mubr.f32.vlgmr.msra.gmra.mrb[0].mxu1 %v447_v57 }
 0x139   : > { %v448_v61 = vmul.f32 %v444_v59, %v348_v60 }
 0x13a   : > { %v352_v62 = vpop.f32.mrb[6].mxu0 }
 0x13b   : > { %v445_v63 = vmax.f32 %v352_v62, 0.0  ;;  %v354_v0 = vpop.f32.mrb[7].mxu0  ;;  %771 = vmatprep.mubr.f32.mxu1 %v448_v61 }
 0x13d   : > { %v449_v1 = vmul.f32 %v445_v63, %v354_v0 }
 0x13e   : > { %v732_v2 = vpop.f32.mrb[8].mxu0 }
 0x13f   : > { %772 = vmatmul.mubr.f32.gmra.mrb[2].mxu1 %v449_v1  ;;  %v423_v3 = vpop.f32.mrb[9].mxu0 }
 0x142   : > { %v735_v4 = vpop.f32.mrb[10].mxu0 }
 0x143   : > { %v433_v5 = vpop.f32.mrb[11].mxu0 }
 0x20a   : > { %v770_v6 = vpop.f32.mrb[0].mxu1 }
 0x20b   : > { %v538_v7 = vadd.f32 %v770_v6, %v732_v2  ;;  %v532_v8 = vpop.f32.mrb[1].mxu1 }
 0x20c   : > { %v533_v9 = vadd.f32 %v532_v8, %v423_v3 }
 0x20d   : > { %552 = vst [vmem:[%s206_s30 + $0x8] sm:$0xff] %v538_v7 }
 0x20e   : > { %551 = vst [vmem:[%s206_s30] sm:$0xff] %v533_v9 }
 0x210   : > { %562 = sbr.rel (!%p1276_p10) target bundleno = 563 (0x233), region = 44 }
 0x212   : > { %v773_v10 = vpop.f32.mrb[2].mxu1 }
 0x213   : > { %v548_v11 = vadd.f32 %v773_v10, %v735_v4  ;;  %v542_v12 = vpop.f32.mrb[3].mxu1 }
 0x214   : > { %v543_v13 = vadd.f32 %v542_v12, %v433_v5 }
 0x215   : > { %554 = vst [vmem:[%s206_s30 + $0x18] sm:$0xff] %v548_v11 }
 0x216   : > { %553 = vst [vmem:[%s206_s30 + $0x10] sm:$0xff] %v543_v13 }
 0x217   : > { %s1283_s5 = smov (!%p565_p1, %s564_s5), 4 }
 0x218   : > { %s1206_s6 = sshll.u32 %s1283_s5, 7 }
 0x219   : > { %s569_s7 = ssub.s32 512, %s1206_s6 }
 0x21a   : > { %570 = vsyncadd %s1201_s4, %s569_s7  ;;  %p684_p2 = scmp.ne.s32.totalorder %s1206_s6, 0  ;;  %s690_s26 = sshll.u32 %s1071_s16, 9 }
 0x21b   : > { %s1215_s22 = scalar_lea.hbm %s1264_s3, %s690_s26  ;;  %s575_s10 = sshll.u32 %s206_s30, 4  ;;  %s1217_s10 = int_to_ptr.vmem [resolvable:$true] %s575_s10 }
 0x21c   : > { %s948_s11 = scalar_lea.vmem %s1217_s10, %s1206_s6  ;;  %s1027_s27 = smov [#allocation7]  }
 0x21d   : > { %p949_p3 = scmp.ne.s32.totalorder %s1217_s10, %s948_s11  ;;  %s952_s24 = sshll.u32 %s1027_s27, 4  ;;  %s953_s24 = int_to_ptr.vmem [resolvable:$false] %s952_s24 }
 0x21e   : > { %s954_s16 = scalar_lea.vmem %s953_s24, 1024  ;;  %p955_p8 = scmp.lt.s32.totalorder %s1217_s10, %s953_s24 }
 0x21f   : > { %p950_p4 = pnand %p949_p3, %p684_p2  ;;  %p956_p11 = scmp.lt.s32.totalorder %s954_s16, %s948_s11 }
 0x221   : > { %p951_p7 = pneg %p950_p4  ;;  %p957_p13 = por %p956_p11, %p955_p8 }
 0x223   : > { %p958_p0 = pnand %p957_p13, %p951_p7 }
 0x225   : > { %961 = shalt.err (!%p958_p0)
}
 0x226   : > { %s962_s29 = scalar_lea.hbm %s1215_s22, %s1206_s6  ;;  %s966_s20 = scalar_lea.hbm %s1264_s3, 896 }
 0x227   : > { %p963_p5 = scmp.ne.s32.totalorder %s1215_s22, %s962_s29  ;;  %p967_p12 = scmp.lt.u32.totalorder %s1215_s22, %s1264_s3 }
 0x228   : > { %p968_p10 = scmp.lt.u32.totalorder %s966_s20, %s962_s29  ;;  %p970_p3 = scmp.lt.u32.totalorder %s962_s29, %s1215_s22 }
 0x229   : > { %p964_p6 = pnand %p963_p5, %p684_p2 }
 0x22a   : > { %p969_p1 = por %p968_p10, %p967_p12 }
 0x22b   : > { %p965_p9 = pneg %p964_p6 }
 0x22c   : > { %p971_p4 = por %p970_p3, %p969_p1 }
 0x22e   : > { %p972_p7 = pnand %p971_p4, %p965_p9 }
 0x230   : > { %975 = shalt.err (!%p972_p7)
}
 0x231   : > { %s1028_s30 = smov 128   ;;  %s1029_s5 = smov 8  }
 0x232   : > { %581 = dma.vmem_to_hbm [thread:$0]  (%p684_p2), %s1217_s10, %s1206_s6, %s1215_s22, %s1201_s4, %s1028_s30, %s1028_s30, %s1029_s5  }
 0x233 PF: > { %p850_p8 = scmp.ge.s32.totalorder %s1018_s15, 2  ;;  %s590_s7 = sand.u32 1, %s1006_s12  }
 0x234   : > { %p1277_p11 = scmp.ne.s32.totalorder %s1268_s23, 0  ;;  %s591_s26 = scalar_lea.sflag [#allocation4], %s590_s7 }
 0x236   : > { %p843_p13 = pnand %p850_p8, %p1277_p11 }
 0x238   : > { %1001 = dma.done.wait (!%p843_p13), %s591_s26, 512  }
 0x239   : > { %1003 = vsyncadd (!%p843_p13), %s591_s26, 4294966784  ;;  %p15_p0 = scmp.ge.s32.totalorder %s1075_s18, 4   ;;  %s1278_s12 = smov %s1010_s13 }
 0x23a   : > { %s1279_s13 = smov %s1014_s14  ;;  %s1280_s14 = smov %s1086_s21 }
 0x23b   : > { %s1281_s15 = smov %s1075_s18  ;;  %17 = sbr.rel (!%p15_p0) target bundleno = 5 (0x5), region = 76 }
 0x242   :  { %596 = vsyncpa [#allocation3], 1 }
 0x243   :  { %598 = vsyncpa [#allocation3 + $0x1], 1 }
 0x244   :  { %599 = vsyncpa [#allocation6], 1 }
 0x245   :  { %600 = vsyncpa [#allocation4], 1 }
 0x246   :  { %602 = vsyncpa [#allocation4 + $0x1], 1 }

// kernel: tpu_custom_call.1
= control target key start
LH: loop header
LB: loop body
LE: loop exit
PB: predicated region body
PF: predicated region fallthrough
CT: control target
= control target key end

     0   :  { %8 = vsyncpa [#allocation3], 0  ;;  %s1261_s0 = inlined_call_operand.vmem [shape: f32[50,35], index: 0, kind: input, shape index: {}]   ;;  %s1262_s1 = inlined_call_operand.hbm [shape: f32[35,384], index: 1, kind: input, shape index: {}]   ;;  %s1263_s2 = inlined_call_operand.hbm [shape: f32[128,128], index: 2, kind: input, shape index: {}]   ;;  %s1264_s3 = inlined_call_operand.hbm [shape: f32[50,128], index: 3, kind: output, shape index: {}]  }
   0x1   :  { %9 = vsyncpa [#allocation6], 0 }
   0x2   :  { %10 = vsyncpa [#allocation4], 0 }
   0x3   :  { %12 = vsyncpa [#allocation4 + $0x1], 0  ;;  %s1050_s12 = smov 0   ;;  %s1052_s13 = smov 0  }
   0x4   :  { %s1054_s14 = smov 0   ;;  %s1056_s15 = smov 0  }
   0x5 LB: > { %s1071_s16 = sadd.s32 4294967295, %s1018_s15   ;;  %s659_s17 = sadd.s32 4294967294, %s1018_s15   ;;  %s1018_s15 = sphi %s1056_s15, %s1281_s15   ;;  %s1014_s14 = sphi %s1054_s14, %s1280_s14   ;;  %s1010_s13 = sphi %s1052_s13, %s1279_s13   ;;  %s1006_s12 = sphi %s1050_s12, %s1278_s12  }
   0x6   : > { %s1075_s18 = sadd.s32 1, %s1018_s15   ;;  %s93_s19 = sadd.s32 1, %s1014_s14 }
   0x7   : > { %s90_s20 = ssub.s32 %s1018_s15, %s1075_s18  ;;  %p103_p0 = scmp.ne.s32.totalorder %s1014_s14, %s1010_s13 }
   0x8   : > { %p91_p1 = scmp.eq.s32.totalorder %s90_s20, 0  ;;  %p104_p2 = scmp.eq.s32.totalorder %s1071_s16, 1 }
   0x9   : > { %p109_p3 = scmp.ne.s32.totalorder %s1010_s13, %s1006_s12  ;;  %p110_p4 = scmp.eq.s32.totalorder %s659_s17, 1 }
   0xa   : > { %s1086_s21 = scalar_select %p91_p1, %s1014_s14, %s93_s19  }
   0xb   : > { %p1088_p5 = por %p104_p2, %p103_p0  ;;  %p1092_p6 = por %p110_p4, %p109_p3 }
   0xc   : > { %p660_p7 = scmp.ge.s32.totalorder %s1018_s15, 1  ;;  %p117_p8 = scmp.lt.s32.totalorder %s1018_s15, 3 }
   0xd   : > { %s1267_s22 = scalar_select %p1088_p5, 1, 0 }
   0xe   : > { %s1268_s23 = scalar_select %p1092_p6, 1, 0 }
   0xf   : > { %p1265_p9 = scmp.eq.s32.totalorder %s1071_s16, 0  ;;  %p1099_p10 = pnand %p660_p7, %p117_p8 }
  0x10   : > { %s1020_s25 = smov [#allocation2]   ;;  %s1021_s28 = smov [#allocation5]  }
  0x11   : > { %s1269_s24 = scalar_select %p1099_p10, 1, 0 }
  0x12   : > { %s129_s26 = sshll.u32 %s1020_s25, 4  ;;  %p835_p11 = pneg %p1099_p10  ;;  %s130_s26 = int_to_ptr.vmem [resolvable:$true] %s129_s26 }
  0x13   : > { %s142_s29 = sshll.u32 %s1021_s28, 4  ;;  %s892_s5 = scalar_lea.hbm %s1262_s1, 1920  ;;  %s1111_s29 = int_to_ptr.vmem [resolvable:$true] %s142_s29 }
  0x14   : > { %p1107_p12 = pnand %p1265_p9, %p835_p11  ;;  %p893_p13 = scmp.ne.s32.totalorder %s1262_s1, %s892_s5 }
  0x15   : > { %p899_p3 = scmp.lt.u32.totalorder %s892_s5, %s1262_s1 }
  0x16   : > { %p894_p0 = pneg %p1107_p12 }
  0x18   : > { %p895_p1 = pnand %p894_p0, %p893_p13 }
  0x1a   : > { %p896_p2 = pneg %p895_p1 }
  0x1c   : > { %p901_p4 = pnand %p899_p3, %p896_p2 }
  0x1e   : > { %904 = shalt.err (!%p901_p4)
}
  0x1f   : > { %s905_s10 = scalar_lea.vmem %s130_s26, 1920  ;;  %p913_p9 = scmp.lt.s32.totalorder %s130_s26, %s130_s26 }
  0x20   : > { %p906_p7 = scmp.ne.s32.totalorder %s130_s26, %s905_s10  ;;  %p914_p6 = scmp.lt.s32.totalorder %s905_s10, %s905_s10 }
  0x22   : > { %p908_p8 = pnand %p906_p7, %p894_p0  ;;  %p915_p5 = por %p914_p6, %p913_p9 }
  0x24   : > { %p909_p11 = pneg %p908_p8 }
  0x26   : > { %p916_p10 = pnand %p915_p5, %p909_p11 }
  0x28   : > { %919 = shalt.err (!%p916_p10)
}
  0x29   : > { %s1022_s11 = smov 384   ;;  %s1023_s17 = smov 24  }
  0x2a   : > { %838 = dma.hbm_to_vmem [thread:$0]  (!%p1107_p12), %s1262_s1, 1920, %s130_s26, [#allocation3], %s1022_s11, %s1022_s11, %s1023_s17  }
  0x2b   : > { %s920_s30 = scalar_lea.hbm %s1263_s2, 2048 }
  0x2c   : > { %p921_p13 = scmp.ne.s32.totalorder %s1263_s2, %s920_s30  ;;  %p927_p9 = scmp.lt.u32.totalorder %s920_s30, %s1263_s2 }
  0x2e   : > { %p923_p5 = pnand %p921_p13, %p894_p0 }
  0x30   : > { %p924_p6 = pneg %p923_p5 }
  0x32   : > { %p929_p10 = pnand %p927_p9, %p924_p6 }
  0x34   : > { %932 = shalt.err (!%p929_p10)
}
  0x35   : > { %s933_s26 = scalar_lea.vmem %s1111_s29, 2048  ;;  %p941_p4 = scmp.lt.s32.totalorder %s1111_s29, %s1111_s29 }
  0x36   : > { %p934_p1 = scmp.ne.s32.totalorder %s1111_s29, %s933_s26  ;;  %p942_p7 = scmp.lt.s32.totalorder %s933_s26, %s933_s26 }
  0x38   : > { %p936_p2 = pnand %p934_p1, %p894_p0  ;;  %p943_p8 = por %p942_p7, %p941_p4 }
  0x3a   : > { %p937_p3 = pneg %p936_p2 }
  0x3c   : > { %p944_p11 = pnand %p943_p8, %p937_p3 }
  0x3e   : > { %947 = shalt.err (!%p944_p11)
}
  0x3f   : > { %s1024_s8 = smov 128   ;;  %s1025_s9 = smov 8  }
  0x40   : > { %841 = dma.hbm_to_vmem [thread:$0]  (!%p1107_p12), %s1263_s2, 2048, %s1111_s29, [#allocation6], %s1024_s8, %s1024_s8, %s1025_s9  }
  0x41   : > { %p1271_p13 = scmp.ne.s32.totalorder %s1269_s24, 0 }
  0x42   : > { %p1272_p0 = scmp.eq.s32.totalorder (!%p1271_p13), %s1071_s16, 0 }
  0x43   : > { %175 = sbr.rel (%p1271_p13) target bundleno = 563 (0x233), region = 32 }
  0x4a   : > { %993 = dma.done.wait (%p1272_p0), [#allocation3], 1920   ;;  %p1273_p5 = pmov %p1272_p0 }
  0x4b   : > { %p1274_p6 = pmov %p1272_p0 }
  0x4c   : > { %995 = vsyncadd (%p1273_p5), [#allocation3], 4294965376 }
  0x4d   : > { %997 = dma.done.wait (%p1274_p6), [#allocation6], 2048   ;;  %p1275_p9 = pmov %p1272_p0 }
  0x4e   : > { %s1171_s27 = sshll.u32 %s1071_s16, 2  ;;  %v1026_v0 = vmov 0.0   ;;  %v231_v1 = vld [vmem:[#allocation2 + $0x8] sm:$0xff]  ;;  %v234_v2 = vld [vmem:[#allocation2 + $0x20] sm:$0xff]  ;;  %v233_v5 = vld [vmem:[#allocation2 + $0x18] sm:$0xff]  ;;  %vm258_vm0 = vcmask 1042432  }
  0x4f   : > { %999 = vsyncadd (%p1275_p9), [#allocation6], 4294965248  ;;  %332 = vmatprep.mubr.f32.mxu0 %v1026_v0  ;;  %p212_p12 = scmp.lt.s32.totalorder %s1171_s27, 6  ;;  %v230_v3 = vld [vmem:[#allocation2] sm:$0xff]  ;;  %v774_v4 = vpack.c.bf16 %v234_v2, %v231_v1  ;;  %v237_v6 = vld [vmem:[#allocation2 + $0x38] sm:$0xff]  ;;  %vm245_vm1 = vcmask 285696  }
  0x50   : > { %v240_v7 = vld [vmem:[#allocation2 + $0x50] sm:$0xff]  ;;  %v776_v8 = vpack.c.bf16 %v233_v5, %v230_v3  ;;  %v239_v11 = vld [vmem:[#allocation2 + $0x48] sm:$0xff]  ;;  %v450_v13 = vld [vmem:[#allocation5] sm:$0xff]  ;;  %s204_s25 = sand.u32 1, %s1010_s13   ;;  %p1276_p10 = scmp.ne.s32.totalorder %s1267_s22, 0 }
  0x51   : > { %s213_s24 = scalar_select %p212_p12, %s1171_s27, 6  ;;  %v778_v9 = vpack.c.bf16 %v240_v7, %v237_v6  ;;  %v236_v10 = vld [vmem:[#allocation2 + $0x30] sm:$0xff]  ;;  %775 = vmatprep.subr.bf16.mxu0 %v774_v4  ;;  %v451_v14 = vld [vmem:[#allocation5 + $0x8] sm:$0xff]  ;;  %v452_v15 = vld [vmem:[#allocation5 + $0x10] sm:$0xff] }
  0x52   : > { %777 = vmatpush1.bf16.msra.mxu0 %v776_v8  ;;  %v780_v12 = vpack.c.bf16 %v239_v11, %v236_v10  ;;  %v453_v16 = vld [vmem:[#allocation5 + $0x18] sm:$0xff]  ;;  %v243_v17 = vld [vmem:[#allocation2 + $0x68] sm:$0x7]  ;;  %v790_v18 = vpack.c.bf16 %v451_v14, %v450_v13  ;;  %v454_v20 = vld [vmem:[#allocation5 + $0x20] sm:$0xff]  ;;  %s667_s28 = sshll.u32 %s204_s25, 5  ;;  %s1201_s4 = scalar_lea.sflag [#allocation4], %s204_s25 }
  0x53   : > { %s669_s29 = sshll.u32 %s213_s24, 3  ;;  %779 = vmatprep.subr.bf16.mxu0 %v778_v9  ;;  %v794_v19 = vpack.c.bf16 %v453_v16, %v452_v15  ;;  %v455_v21 = vld [vmem:[#allocation5 + $0x28] sm:$0xff]  ;;  %v232_v22 = vld [vmem:[#allocation2 + $0x10] sm:$0xff]  ;;  %v235_v23 = vld [vmem:[#allocation2 + $0x28] sm:$0xff]  ;;  %s206_s30 = scalar_lea.vmem [#allocation7], %s667_s28 }
  0x54   : > { %s1179_s20 = scalar_lea.vmem %s1261_s0, %s669_s29  ;;  %791 = vmatprep.subr.bf16.mxu1 %v790_v18  ;;  %v242_v24 = vld [vmem:[#allocation2 + $0x60] sm:$0x7]  ;;  %v798_v26 = vpack.c.bf16 %v455_v21, %v454_v20  ;;  %v456_v27 = vld [vmem:[#allocation5 + $0x30] sm:$0xff]  ;;  %v457_v28 = vld [vmem:[#allocation5 + $0x38] sm:$0xff]  ;;  %v782_v29 = vpack.c.bf16 %v235_v23, %v232_v22  ;;  %s564_s5 = ssub.s32 (%p1276_p10), 7, %s1171_s27 }
  0x55   : > { %793 = vmatpush3.bf16.msra.mxu1 %v790_v18  ;;  %v226_v25 = vld [vmem:[%s1179_s20] sm:$0xff]  ;;  %v227_v30 = vld [vmem:[%s1179_s20 + $0x8] sm:$0xff]  ;;  %v802_v31 = vpack.c.bf16 %v457_v28, %v456_v27  ;;  %v458_v32 = vld [vmem:[#allocation5 + $0x40] sm:$0xff]  ;;  %p565_p1 = scmp.lt.s32.totalorder (%p1276_p10), %s564_s5, 4 }
  0x56   : > { %781 = vmatpush1.bf16.msra.mxu0 %v780_v12  ;;  %795 = vmatprep.subr.bf16.mxu1 %v794_v19  ;;  %v459_v33 = vld [vmem:[#allocation5 + $0x48] sm:$0xff]  ;;  %v228_v34 = vld [vmem:[%s1179_s20 + $0x10] sm:$0xff]  ;;  %v460_v36 = vld [vmem:[#allocation5 + $0x50] sm:$0xff] }
  0x57   : > { %670 = vmatprep.subr.msk.mxu0 %vm258_vm0, %v243_v17  ;;  %v806_v35 = vpack.c.bf16 %v459_v33, %v458_v32  ;;  %v461_v37 = vld [vmem:[#allocation5 + $0x58] sm:$0xff]  ;;  %v229_v38 = vld [vmem:[%s1179_s20 + $0x18] sm:$0xff]  ;;  %v462_v40 = vld [vmem:[#allocation5 + $0x60] sm:$0xff] }
  0x58   : > { %v810_v39 = vpack.c.bf16 %v461_v37, %v460_v36  ;;  %v463_v41 = vld [vmem:[#allocation5 + $0x68] sm:$0xff]  ;;  %v241_v44 = vld [vmem:[#allocation2 + $0x58] sm:$0xff]  ;;  %v464_v46 = vld [vmem:[#allocation5 + $0x70] sm:$0xff] }
  0x59   : > { %797 = vmatpush3.bf16.msra.mxu1 %v794_v19  ;;  %v814_v42 = vpack.c.bf16 %v463_v41, %v462_v40  ;;  %v238_v43 = vld [vmem:[#allocation2 + $0x40] sm:$0xff]  ;;  %v465_v47 = vld [vmem:[#allocation5 + $0x78] sm:$0xff] }
  0x5a   : > { %671 = vmatpush1.msk.msra.mxu0 %vm258_vm0, %v242_v24  ;;  %799 = vmatprep.subr.bf16.mxu1 %v798_v26  ;;  %v786_v45 = vpack.c.bf16 %v241_v44, %v238_v43  ;;  %v818_v48 = vpack.c.bf16 %v465_v47, %v464_v46  ;;  %v244_v49 = vld [vmem:[#allocation2 + $0x70] sm:$0x7] }
  0x5b   : > { %672 = vmatmul.mubr.msk.f32.vlgmr.msra.gmra.mrb[0].mxu0 %vm245_vm1, %v226_v25  ;;  %783 = vmatprep.subr.bf16.mxu0 %v782_v29 }
  0x5c   : > { %338 = vmatprep.mubr.f32.mxu0 %v1026_v0  ;;  %785 = vmatpush3.bf16.msra.mxu0 %v782_v29 }
  0x5d   : > { %801 = vmatpush3.bf16.msra.mxu1 %v798_v26  ;;  %787 = vmatprep.subr.bf16.mxu0 %v786_v45 }
  0x5e   : > { %803 = vmatprep.subr.bf16.mxu1 %v802_v31 }
  0x5f   : > { %673 = vmatmul.mubr.msk.f32.gmra.mrb[2].mxu0 %vm245_vm1, %v227_v30 }
  0x60   : > { %344 = vmatprep.mubr.f32.mxu0 %v1026_v0  ;;  %789 = vmatpush3.bf16.msra.mxu0 %v786_v45 }
  0x61   : > { %805 = vmatpush3.bf16.msra.mxu1 %v802_v31  ;;  %728 = vmatprep.subr.msk.mxu0 %vm258_vm0, %v244_v49 }
  0x62   : > { %807 = vmatprep.subr.bf16.mxu1 %v806_v35 }
  0x63   : > { %674 = vmatmul.mubr.msk.f32.gmra.mrb[4].mxu0 %vm245_vm1, %v228_v34 }
  0x64   : > { %350 = vmatprep.mubr.f32.mxu0 %v1026_v0  ;;  %729 = vmatpush3.msk.msra.mxu0 %vm258_vm0, %v244_v49 }
  0x65   : > { %809 = vmatpush3.bf16.msra.mxu1 %v806_v35 }
  0x66   : > { %811 = vmatprep.subr.bf16.mxu1 %v810_v39 }
  0x67   : > { %675 = vmatmul.mubr.msk.f32.gmra.mrb[6].mxu0 %vm245_vm1, %v229_v38 }
  0x68   : > { %730 = vmatprep.mubr.msk.f32.mxu0 %vm245_vm1, %v226_v25 }
  0x69   : > { %813 = vmatpush3.bf16.msra.mxu1 %v810_v39 }
  0x6a   : > { %815 = vmatprep.subr.bf16.mxu1 %v814_v42 }
  0x6b   : > { %731 = vmatmul.mubr.msk.f32.vlgmr.msra.gmra.mrb[8].mxu0 %vm245_vm1, %v227_v30 }
  0x6c   : > { %733 = vmatprep.mubr.msk.f32.mxu0 %vm245_vm1, %v228_v34 }
  0x6d   : > { %817 = vmatpush3.bf16.msra.mxu1 %v814_v42 }
  0x6e   : > { %819 = vmatprep.subr.bf16.mxu1 %v818_v48 }
  0x6f   : > { %734 = vmatmul.mubr.msk.f32.gmra.mrb[10].mxu0 %vm245_vm1, %v229_v38 }
  0x71   : > { %821 = vmatpush3.bf16.msra.mxu1 %v818_v48 }
 0x12e   : > { %v334_v50 = vpop.f32.mrb[0].mxu0 }
 0x12f   : > { %v442_v51 = vmax.f32 %v334_v50, 0.0  ;;  %v336_v52 = vpop.f32.mrb[1].mxu0 }
 0x131   : > { %v446_v53 = vmul.f32 %v442_v51, %v336_v52 }
 0x132   : > { %v340_v54 = vpop.f32.mrb[2].mxu0 }
 0x133   : > { %v443_v55 = vmax.f32 %v340_v54, 0.0  ;;  %v342_v56 = vpop.f32.mrb[3].mxu0  ;;  %768 = vmatprep.mubr.f32.mxu1 %v446_v53 }
 0x135   : > { %v447_v57 = vmul.f32 %v443_v55, %v342_v56 }
 0x136   : > { %v346_v58 = vpop.f32.mrb[4].mxu0 }
 0x137   : > { %v444_v59 = vmax.f32 %v346_v58, 0.0  ;;  %v348_v60 = vpop.f32.mrb[5].mxu0  ;;  %769 = vmatmul.mubr.f32.vlgmr.msra.gmra.mrb[0].mxu1 %v447_v57 }
 0x139   : > { %v448_v61 = vmul.f32 %v444_v59, %v348_v60 }
 0x13a   : > { %v352_v62 = vpop.f32.mrb[6].mxu0 }
 0x13b   : > { %v445_v63 = vmax.f32 %v352_v62, 0.0  ;;  %v354_v0 = vpop.f32.mrb[7].mxu0  ;;  %771 = vmatprep.mubr.f32.mxu1 %v448_v61 }
 0x13d   : > { %v449_v1 = vmul.f32 %v445_v63, %v354_v0 }
 0x13e   : > { %v732_v2 = vpop.f32.mrb[8].mxu0 }
 0x13f   : > { %772 = vmatmul.mubr.f32.gmra.mrb[2].mxu1 %v449_v1  ;;  %v423_v3 = vpop.f32.mrb[9].mxu0 }
 0x142   : > { %v735_v4 = vpop.f32.mrb[10].mxu0 }
 0x143   : > { %v433_v5 = vpop.f32.mrb[11].mxu0 }
 0x20a   : > { %v770_v6 = vpop.f32.mrb[0].mxu1 }
 0x20b   : > { %v538_v7 = vadd.f32 %v770_v6, %v732_v2  ;;  %v532_v8 = vpop.f32.mrb[1].mxu1 }
 0x20c   : > { %v533_v9 = vadd.f32 %v532_v8, %v423_v3 }
 0x20d   : > { %552 = vst [vmem:[%s206_s30 + $0x8] sm:$0xff] %v538_v7 }
 0x20e   : > { %551 = vst [vmem:[%s206_s30] sm:$0xff] %v533_v9 }
 0x210   : > { %562 = sbr.rel (!%p1276_p10) target bundleno = 563 (0x233), region = 44 }
 0x212   : > { %v773_v10 = vpop.f32.mrb[2].mxu1 }
 0x213   : > { %v548_v11 = vadd.f32 %v773_v10, %v735_v4  ;;  %v542_v12 = vpop.f32.mrb[3].mxu1 }
 0x214   : > { %v543_v13 = vadd.f32 %v542_v12, %v433_v5 }
 0x215   : > { %554 = vst [vmem:[%s206_s30 + $0x18] sm:$0xff] %v548_v11 }
 0x216   : > { %553 = vst [vmem:[%s206_s30 + $0x10] sm:$0xff] %v543_v13 }
 0x217   : > { %s1283_s5 = smov (!%p565_p1, %s564_s5), 4 }
 0x218   : > { %s1206_s6 = sshll.u32 %s1283_s5, 7 }
 0x219   : > { %s569_s7 = ssub.s32 512, %s1206_s6 }
 0x21a   : > { %570 = vsyncadd %s1201_s4, %s569_s7  ;;  %p684_p2 = scmp.ne.s32.totalorder %s1206_s6, 0  ;;  %s690_s26 = sshll.u32 %s1071_s16, 9 }
 0x21b   : > { %s1215_s22 = scalar_lea.hbm %s1264_s3, %s690_s26  ;;  %s575_s10 = sshll.u32 %s206_s30, 4  ;;  %s1217_s10 = int_to_ptr.vmem [resolvable:$true] %s575_s10 }
 0x21c   : > { %s948_s11 = scalar_lea.vmem %s1217_s10, %s1206_s6  ;;  %s1027_s27 = smov [#allocation7]  }
 0x21d   : > { %p949_p3 = scmp.ne.s32.totalorder %s1217_s10, %s948_s11  ;;  %s952_s24 = sshll.u32 %s1027_s27, 4  ;;  %s953_s24 = int_to_ptr.vmem [resolvable:$false] %s952_s24 }
 0x21e   : > { %s954_s16 = scalar_lea.vmem %s953_s24, 1024  ;;  %p955_p8 = scmp.lt.s32.totalorder %s1217_s10, %s953_s24 }
 0x21f   : > { %p950_p4 = pnand %p949_p3, %p684_p2  ;;  %p956_p11 = scmp.lt.s32.totalorder %s954_s16, %s948_s11 }
 0x221   : > { %p951_p7 = pneg %p950_p4  ;;  %p957_p13 = por %p956_p11, %p955_p8 }
 0x223   : > { %p958_p0 = pnand %p957_p13, %p951_p7 }
 0x225   : > { %961 = shalt.err (!%p958_p0)
}
 0x226   : > { %s962_s29 = scalar_lea.hbm %s1215_s22, %s1206_s6  ;;  %s966_s20 = scalar_lea.hbm %s1264_s3, 896 }
 0x227   : > { %p963_p5 = scmp.ne.s32.totalorder %s1215_s22, %s962_s29  ;;  %p967_p12 = scmp.lt.u32.totalorder %s1215_s22, %s1264_s3 }
 0x228   : > { %p968_p10 = scmp.lt.u32.totalorder %s966_s20, %s962_s29  ;;  %p970_p3 = scmp.lt.u32.totalorder %s962_s29, %s1215_s22 }
 0x229   : > { %p964_p6 = pnand %p963_p5, %p684_p2 }
 0x22a   : > { %p969_p1 = por %p968_p10, %p967_p12 }
 0x22b   : > { %p965_p9 = pneg %p964_p6 }
 0x22c   : > { %p971_p4 = por %p970_p3, %p969_p1 }
 0x22e   : > { %p972_p7 = pnand %p971_p4, %p965_p9 }
 0x230   : > { %975 = shalt.err (!%p972_p7)
}
 0x231   : > { %s1028_s30 = smov 128   ;;  %s1029_s5 = smov 8  }
 0x232   : > { %581 = dma.vmem_to_hbm [thread:$0]  (%p684_p2), %s1217_s10, %s1206_s6, %s1215_s22, %s1201_s4, %s1028_s30, %s1028_s30, %s1029_s5  }
 0x233 PF: > { %p850_p8 = scmp.ge.s32.totalorder %s1018_s15, 2  ;;  %s590_s7 = sand.u32 1, %s1006_s12  }
 0x234   : > { %p1277_p11 = scmp.ne.s32.totalorder %s1268_s23, 0  ;;  %s591_s26 = scalar_lea.sflag [#allocation4], %s590_s7 }
 0x236   : > { %p843_p13 = pnand %p850_p8, %p1277_p11 }
 0x238   : > { %1001 = dma.done.wait (!%p843_p13), %s591_s26, 512  }
 0x239   : > { %1003 = vsyncadd (!%p843_p13), %s591_s26, 4294966784  ;;  %p15_p0 = scmp.ge.s32.totalorder %s1075_s18, 4   ;;  %s1278_s12 = smov %s1010_s13 }
 0x23a   : > { %s1279_s13 = smov %s1014_s14  ;;  %s1280_s14 = smov %s1086_s21 }
 0x23b   : > { %s1281_s15 = smov %s1075_s18  ;;  %17 = sbr.rel (!%p15_p0) target bundleno = 5 (0x5), region = 76 }
 0x242   :  { %596 = vsyncpa [#allocation3], 1 }
 0x243   :  { %598 = vsyncpa [#allocation3 + $0x1], 1 }
 0x244   :  { %599 = vsyncpa [#allocation6], 1 }
 0x245   :  { %600 = vsyncpa [#allocation4], 1 }
 0x246   :  { %602 = vsyncpa [#allocation4 + $0x1], 1 }

</bundles_post_ra>
